<compile_context>
chip_gen: v6e
topology: v6e:2x2x1
jax: 0.10.0
libtpu: 0.0.40
codegen_flags: <defaults>
</compile_context>

<pallas_src>
import functools

import jax
import jax.numpy as jnp
from jax.experimental import pallas as pl
from jax.experimental.pallas import tpu as pltpu


NCLASS = 10
IN_FEATURES = 3 * 32 * 32      # 3072, hard-coded by nn.Linear(3072, M)
LANE = 128
_MIB = 1024 * 1024


def _cdiv(a, b):
    return -(-a // b)


def _round_up(n, m):
    return _cdiv(n, m) * m


# ----------------------------------------------------------------------------
# Shared fused-MLP compute: (x @ W1 + b1) -> ReLU -> (@ W2 + b2), f32 logits
# ----------------------------------------------------------------------------
def _compute_logits(x_ref, w1_ref, b1_ref, w2_ref, b2_ref):
    x = x_ref[...]                                            # (TM, K) bf16
    h = jnp.dot(x, w1_ref[...], preferred_element_type=jnp.float32)
    h = jnp.maximum(h + b1_ref[...], 0.0)                     # (TM, Mp) f32
    logits = jnp.dot(h.astype(w2_ref.dtype), w2_ref[...],
                     preferred_element_type=jnp.float32)      # (TM, Np) f32
    return logits + b2_ref[...]


# ----------------------------------------------------------------------------
# Kernel 1: forward — store bf16 logits (lane-dense, padded class dim)
# ----------------------------------------------------------------------------
def _mlp_fwd_kernel(x_ref, w1_ref, b1_ref, w2_ref, b2_ref, o_ref):
    o_ref[...] = _compute_logits(x_ref, w1_ref, b1_ref, w2_ref,
                                 b2_ref).astype(o_ref.dtype)


# ----------------------------------------------------------------------------
# Kernel 2: fused forward + cross-entropy + argmax-correct epilogue
#   Writes per-row loss and per-row correct flag (tiny), no logits writeback.
#   Each grid step writes its own output block -> safe under "parallel".
# ----------------------------------------------------------------------------
def _mlp_loss_acc_kernel(x_ref, w1_ref, b1_ref, w2_ref, b2_ref, labels_ref,
                         loss_ref, corr_ref, *, nclass, total):
    i = pl.program_id(0)
    logits = _compute_logits(x_ref, w1_ref, b1_ref, w2_ref, b2_ref)
    TM, NP = logits.shape

    cls = jax.lax.broadcasted_iota(jnp.int32, (TM, NP), 1)
    col_valid = cls < nclass                                  # mask padded classes
    masked = jnp.where(col_valid, logits, jnp.float32(-1e30))

    row = i * TM + jax.lax.broadcasted_iota(jnp.int32, (TM, 1), 0)
    row_valid = row < total                                   # mask padded rows
    labels = labels_ref[...]                                  # (TM, 1) int32

    # stabilized log-sum-exp (matches torch.nn.CrossEntropyLoss)
    m = jnp.max(masked, axis=1, keepdims=True)
    sumexp = jnp.sum(jnp.where(col_valid, jnp.exp(masked - m), 0.0),
                     axis=1, keepdims=True)
    lse = jnp.log(sumexp) + m
    onehot = (cls == labels).astype(jnp.float32)
    picked = jnp.sum(masked * onehot, axis=1, keepdims=True)
    loss_ref[...] = jnp.where(row_valid, lse - picked, 0.0)

    # torch.max(.,1) argmax = first index achieving the max
    pred = jnp.min(jnp.where(masked == m, cls, NP), axis=1, keepdims=True)
    good = jnp.logical_and(row_valid, pred == labels)
    corr_ref[...] = good.astype(jnp.int32)


# ----------------------------------------------------------------------------
# pallas_call wrappers
# ----------------------------------------------------------------------------
def _weight_specs(K, Mp, Np):
    # Resident operands (constant index_map) — block never changes across the
    # grid so only one DMA is issued even though two buffers are allocated.
    return [
        pl.BlockSpec((K, Mp), lambda i: (0, 0)),      # W1
        pl.BlockSpec((1, Mp), lambda i: (0, 0)),      # b1
        pl.BlockSpec((Mp, Np), lambda i: (0, 0)),     # W2
        pl.BlockSpec((1, Np), lambda i: (0, 0)),      # b2
    ]


def _fwd_pallas(x2d, w1p, b1p, w2p, b2p, *, tm, vlim):
    Bp, K = x2d.shape
    Mp = w1p.shape[1]
    Np = w2p.shape[1]
    grid = (Bp // tm,)
    flops = 2 * Bp * K * Mp + 2 * Bp * Mp * Np
    bytes_accessed = (x2d.size * 2 + w1p.size * 2 + w2p.size * 2
                      + b1p.size * 4 + b2p.size * 4 + Bp * Np * 2)
    return pl.pallas_call(
        _mlp_fwd_kernel,
        out_shape=jax.ShapeDtypeStruct((Bp, Np), jnp.bfloat16),
        grid=grid,
        in_specs=[pl.BlockSpec((tm, K), lambda i: (i, 0))] + _weight_specs(K, Mp, Np),
        out_specs=pl.BlockSpec((tm, Np), lambda i: (i, 0)),
        compiler_params=pltpu.CompilerParams(
            dimension_semantics=("parallel",),
            vmem_limit_bytes=vlim,
        ),
        cost_estimate=pl.CostEstimate(
            flops=flops, transcendentals=0, bytes_accessed=bytes_accessed),
    )(x2d, w1p, b1p, w2p, b2p)


def _loss_acc_pallas(x2d, w1p, b1p, w2p, b2p, labels_p, *, tm, vlim, total_rows):
    Bp, K = x2d.shape
    Mp = w1p.shape[1]
    Np = w2p.shape[1]
    grid = (Bp // tm,)
    flops = 2 * Bp * K * Mp + 2 * Bp * Mp * Np
    bytes_accessed = (x2d.size * 2 + w1p.size * 2 + w2p.size * 2
                      + b1p.size * 4 + b2p.size * 4 + labels_p.size * 4
                      + Bp * 8)
    kernel = functools.partial(_mlp_loss_acc_kernel,
                               nclass=NCLASS, total=total_rows)
    return pl.pallas_call(
        kernel,
        out_shape=(jax.ShapeDtypeStruct((Bp, 1), jnp.float32),
                   jax.ShapeDtypeStruct((Bp, 1), jnp.int32)),
        grid=grid,
        in_specs=([pl.BlockSpec((tm, K), lambda i: (i, 0))]
                  + _weight_specs(K, Mp, Np)
                  + [pl.BlockSpec((tm, 1), lambda i: (i, 0))]),
        out_specs=(pl.BlockSpec((tm, 1), lambda i: (i, 0)),
                   pl.BlockSpec((tm, 1), lambda i: (i, 0))),
        compiler_params=pltpu.CompilerParams(
            dimension_semantics=("parallel",),
            vmem_limit_bytes=vlim,
        ),
        cost_estimate=pl.CostEstimate(
            flops=flops, transcendentals=Bp * Np,
            bytes_accessed=bytes_accessed),
    )(x2d, w1p, b1p, w2p, b2p, labels_p)


# ----------------------------------------------------------------------------
# Tiling / VMEM planning
# ----------------------------------------------------------------------------
def _choose_tm(B):
    """Large row tiles for roofline, but >=2 tiles whenever B > 8 so both of
    v7x's TensorCores get work (v5e/v6e have one TC and are unaffected)."""
    if B <= 8:
        return 8
    if B <= 2048:
        return _round_up(_cdiv(B, 2), 8)   # 2 tiles, minimal padding
    return 1024                            # many 1024-row tiles


def _vmem_bytes(tm, Mp, Np):
    x_tile = 2 * tm * IN_FEATURES * 2                 # bf16 x, double-buffered
    weights = 2 * (IN_FEATURES * Mp + Mp * Np) * 2    # bf16 W1/W2, double-buffered
    biases = 2 * (Mp + Np) * 4
    out = 2 * tm * Np * 2                             # bf16 logits out
    rows = 2 * tm * 12                                # labels + per-row outputs
    return x_tile + weights + biases + out + rows


def _plan(B, Mp, Np):
    tm = _choose_tm(B)
    # stay under a 40 MiB working-set budget (safe inside v7x's 64 MiB VMEM)
    while tm > 8 and _vmem_bytes(tm, Mp, Np) > 40 * _MIB:
        tm = max(8, _round_up(tm // 2, 8))
    Bp = _round_up(B, tm)
    vlim = int(max(32 * _MIB, min(96 * _MIB, _vmem_bytes(tm, Mp, Np) + 8 * _MIB)))
    return tm, Bp, vlim


# ----------------------------------------------------------------------------
# Parameter / input preparation
# ----------------------------------------------------------------------------
def prepare_params(params):
    """bf16-cast weights and zero-pad hidden/class dims to multiples of 128.
    Call once per parameter update and reuse the result (per-call re-padding
    would rival the kernel's own HBM traffic at small batch)."""
    if params.get("_prepared", False):
        return params
    w1, b1, w2, b2 = params["w1"], params["b1"], params["w2"], params["b2"]
    K, M = w1.shape
    assert K == IN_FEATURES, "SingleLayerNet expects 3x32x32 inputs (3072 features)"
    Mp = _round_up(M, LANE)
    Np = _round_up(NCLASS, LANE)
    w1p = jnp.zeros((K, Mp), jnp.bfloat16).at[:, :M].set(w1.astype(jnp.bfloat16))
    b1p = jnp.zeros((1, Mp), jnp.float32).at[:, :M].set(b1.astype(jnp.float32))
    w2p = jnp.zeros((Mp, Np), jnp.bfloat16).at[:M, :NCLASS].set(
        w2.astype(jnp.bfloat16))
    b2p = jnp.zeros((1, Np), jnp.float32).at[:, :NCLASS].set(
        b2.astype(jnp.float32))
    return {"_prepared": True, "w1p": w1p, "b1p": b1p, "w2p": w2p, "b2p": b2p,
            "M": M, "Mp": Mp, "Np": Np}


def _prep_input(x, Bp):
    B = x.shape[0]
    x2d = x.reshape(B, -1).astype(jnp.bfloat16)
    assert x2d.shape[1] == IN_FEATURES, "SingleLayerNet expects 3x32x32 inputs"
    if Bp != B:
        x2d = jnp.zeros((Bp, IN_FEATURES), jnp.bfloat16).at[:B].set(x2d)
    return x2d


# ----------------------------------------------------------------------------
# Wrappers mirroring the PyTorch module
# ----------------------------------------------------------------------------
def n_features(x):
    """ConvolutionalNeuralNet.nFeatures: product of non-batch dims."""
    n = 1
    for s in x.shape[1:]:
        n *= s
    return n


def forward(params, x):
    """SingleLayerNet.forward: flatten -> Linear(3072,M) -> ReLU -> Linear(M,10)."""
    p = prepare_params(params)
    B = x.shape[0]
    tm, Bp, vlim = _plan(B, p["Mp"], p["Np"])
    x2d = _prep_input(x, Bp)
    logits_p = _fwd_pallas(x2d, p["w1p"], p["b1p"], p["w2p"], p["b2p"],
                           tm=tm, vlim=vlim)
    return logits_p[:B, :NCLASS].astype(jnp.float32)


def _run_loss_acc(params, data, labels):
    """Fused forward + CE + correct-count; logits never leave VMEM."""
    p = prepare_params(params)
    B = data.shape[0]
    tm, Bp, vlim = _plan(B, p["Mp"], p["Np"])
    x2d = _prep_input(data, Bp)
    labels_p = jnp.zeros((Bp, 1), jnp.int32).at[:B, 0].set(
        labels.astype(jnp.int32))
    per_row_loss, per_row_ok = _loss_acc_pallas(
        x2d, p["w1p"], p["b1p"], p["w2p"], p["b2p"], labels_p,
        tm=tm, vlim=vlim, total_rows=B)
    ce = jnp.sum(per_row_loss) / jnp.float32(B)
    correct = jnp.sum(per_row_ok)
    return ce, correct, B


def loss_and_accuracy(params, data, labels):
    ce, correct, B = _run_loss_acc(params, data, labels)
    return ce, 100.0 * correct.astype(jnp.float32) / jnp.float32(B)


def loss(params, data, labels):
    """ConvolutionalNeuralNet.loss (CrossEntropyLoss, mean reduction)."""
    return _run_loss_acc(params, data, labels)[0]


def tensor_accuracy(params, data, labels):
    """ConvolutionalNeuralNet._tensorAccuracy: (correct, total)."""
    _, correct, B = _run_loss_acc(params, data, labels)
    return correct, B


def accuracy(params, data, labels):
    """ConvolutionalNeuralNet.accuracy for a (data, labels) pair (percent)."""
    return loss_and_accuracy(params, data, labels)[1]


# ----------------------------------------------------------------------------
if __name__ == "__main__":
    B, C, H, W = 8, 3, 32, 32          # CIFAR-shaped inputs (3072 features)
    M = 128                            # hidden width of SingleLayerNet

    key = jax.random.PRNGKey(0)
    k1, k2, k3, k4, k5, k6 = jax.random.split(key, 6)
    params = {
        "w1": 0.05 * jax.random.normal(k1, (IN_FEATURES, M), jnp.float32),
        "b1": 0.05 * jax.random.normal(k2, (M,), jnp.float32),
        "w2": 0.05 * jax.random.normal(k3, (M, NCLASS), jnp.float32),
        "b2": 0.05 * jax.random.normal(k4, (NCLASS,), jnp.float32),
    }
    x = jax.random.normal(k5, (B, C, H, W), jnp.float32)
    labels = jax.random.randint(k6, (B,), 0, NCLASS, dtype=jnp.int32)

    # Pad/cast the weights ONCE and reuse (hoisted per perf feedback).
    prepared = prepare_params(params)

    logits = jax.block_until_ready(forward(prepared, x))
    ce, acc = loss_and_accuracy(prepared, x, labels)
    correct, total = tensor_accuracy(prepared, x, labels)
    ce = jax.block_until_ready(ce)
    acc = jax.block_until_ready(acc)
    correct = jax.block_until_ready(correct)

    # --- sanity checks -------------------------------------------------------
    assert logits.shape == (B, NCLASS)
    assert n_features(x) == IN_FEATURES
    assert int(total) == B

    # forward vs f32 reference (bf16 operands + bf16 logits store -> loose tol)
    x2d = x.reshape(B, -1)
    h_f32 = jnp.maximum(x2d @ params["w1"] + params["b1"], 0.0)
    logits_f32 = h_f32 @ params["w2"] + params["b2"]
    assert float(jnp.max(jnp.abs(logits - logits_f32))) < 0.3

    # loss / accuracy vs a reference that matches the kernel's bf16/f32 path
    xb = x2d.astype(jnp.bfloat16)
    w1b = params["w1"].astype(jnp.bfloat16)
    w2b = params["w2"].astype(jnp.bfloat16)
    hb = jnp.maximum(jnp.dot(xb, w1b, preferred_element_type=jnp.float32)
                     + params["b1"], 0.0)
    logits_b = jnp.dot(hb.astype(jnp.bfloat16), w2b,
                       preferred_element_type=jnp.float32) + params["b2"]
    lse = jax.nn.logsumexp(logits_b, axis=1)
    ref_loss = jnp.mean(lse - logits_b[jnp.arange(B), labels])
    ref_correct = jnp.sum((jnp.argmax(logits_b, axis=1) == labels).astype(jnp.int32))
    ref_acc = 100.0 * ref_correct.astype(jnp.float32) / jnp.float32(B)

    assert abs(float(ce) - float(ref_loss)) < 5e-3
    assert abs(float(acc) - float(ref_acc)) < 1e-3
    assert int(correct) == int(ref_correct)
    assert bool(jnp.isfinite(ce)) and bool(jnp.isfinite(acc))

    print("KERNEL_OK")
</pallas_src>

<mosaic_0001>
module attributes {stable_mosaic.version = 11 : i64} {
  func.func @_mlp_fwd_kernel(%arg0: i32, %arg1: memref<8x3072xbf16, #tpu.memory_space<vmem>>, %arg2: memref<3072x128xbf16, #tpu.memory_space<vmem>>, %arg3: memref<1x128xf32, #tpu.memory_space<vmem>>, %arg4: memref<128x128xbf16, #tpu.memory_space<vmem>>, %arg5: memref<1x128xf32, #tpu.memory_space<vmem>>, %arg6: memref<8x128xbf16, #tpu.memory_space<vmem>>) attributes {dimension_semantics = [#tpu.dimension_semantics<parallel>], iteration_bounds = array<i64: 1>, scalar_prefetch = 0 : i64, scratch_operands = 0 : i64, tpu.core_type = #tpu.core_type<tc>, window_params = [{transform_indices = @transform_0, window_bounds = array<i64: 8, 3072>}, {pipeline_mode = #tpu.pipeline_mode<synchronous>, transform_indices = @transform_1, window_bounds = array<i64: 3072, 128>}, {pipeline_mode = #tpu.pipeline_mode<synchronous>, transform_indices = @transform_2, window_bounds = array<i64: 1, 128>}, {pipeline_mode = #tpu.pipeline_mode<synchronous>, transform_indices = @transform_3, window_bounds = array<i64: 128, 128>}, {pipeline_mode = #tpu.pipeline_mode<synchronous>, transform_indices = @transform_4, window_bounds = array<i64: 1, 128>}, {transform_indices = @transform_5, window_bounds = array<i64: 8, 128>}]} {
    %c0 = arith.constant 0 : index
    %c0_0 = arith.constant 0 : index
    %0 = vector.load %arg1[%c0, %c0_0] : memref<8x3072xbf16, #tpu.memory_space<vmem>>, vector<8x3072xbf16>
    %c0_1 = arith.constant 0 : index
    %c0_2 = arith.constant 0 : index
    %1 = vector.load %arg2[%c0_1, %c0_2] : memref<3072x128xbf16, #tpu.memory_space<vmem>>, vector<3072x128xbf16>
    %cst = arith.constant dense<0.000000e+00> : vector<8x128xf32>
    %2 = tpu.matmul %0, %1, %cst {dimension_numbers = #tpu.dot_dimension_numbers<[1], [0], [0], [1], [0, 0, 1, 1], [], []>} : vector<8x3072xbf16>, vector<3072x128xbf16>, vector<8x128xf32> -> vector<8x128xf32>
    %c0_3 = arith.constant 0 : index
    %c0_4 = arith.constant 0 : index
    %3 = vector.load %arg3[%c0_3, %c0_4] : memref<1x128xf32, #tpu.memory_space<vmem>>, vector<1x128xf32>
    %4 = vector.broadcast %3 : vector<1x128xf32> to vector<8x128xf32>
    %5 = arith.addf %2, %4 : vector<8x128xf32>
    %cst_5 = arith.constant 0.000000e+00 : f32
    %6 = vector.broadcast %cst_5 : f32 to vector<8x128xf32>
    %7 = arith.maximumf %5, %6 : vector<8x128xf32>
    %8 = arith.truncf %7 : vector<8x128xf32> to vector<8x128xbf16>
    %c0_6 = arith.constant 0 : index
    %c0_7 = arith.constant 0 : index
    %9 = vector.load %arg4[%c0_6, %c0_7] : memref<128x128xbf16, #tpu.memory_space<vmem>>, vector<128x128xbf16>
    %cst_8 = arith.constant dense<0.000000e+00> : vector<8x128xf32>
    %10 = tpu.matmul %8, %9, %cst_8 {dimension_numbers = #tpu.dot_dimension_numbers<[1], [0], [0], [1], [0, 0, 1, 1], [], []>} : vector<8x128xbf16>, vector<128x128xbf16>, vector<8x128xf32> -> vector<8x128xf32>
    %c0_9 = arith.constant 0 : index
    %c0_10 = arith.constant 0 : index
    %11 = vector.load %arg5[%c0_9, %c0_10] : memref<1x128xf32, #tpu.memory_space<vmem>>, vector<1x128xf32>
    %12 = vector.broadcast %11 : vector<1x128xf32> to vector<8x128xf32>
    %13 = arith.addf %10, %12 : vector<8x128xf32>
    %14 = arith.truncf %13 : vector<8x128xf32> to vector<8x128xbf16>
    %c0_11 = arith.constant 0 : index
    %c0_12 = arith.constant 0 : index
    %15 = vector.load %arg6[%c0_11, %c0_12] : memref<8x128xbf16, #tpu.memory_space<vmem>>, vector<8x128xbf16>
    tpu.vector_store %arg6[%c0_11, %c0_12], %14 {strides = array<i32>} : memref<8x128xbf16, #tpu.memory_space<vmem>>, vector<8x128xbf16>,
    return
  }
  func.func @transform_0(%arg0: i32) -> (i32, i32) {
    %c0_i32 = arith.constant 0 : i32
    %c0_i32_0 = arith.constant 0 : i32
    return %arg0, %c0_i32 : i32, i32
  }
  func.func @transform_1(%arg0: i32) -> (i32, i32) {
    %c0_i32 = arith.constant 0 : i32
    %c0_i32_0 = arith.constant 0 : i32
    %c0_i32_1 = arith.constant 0 : i32
    return %c0_i32, %c0_i32_0 : i32, i32
  }
  func.func @transform_2(%arg0: i32) -> (i32, i32) {
    %c0_i32 = arith.constant 0 : i32
    %c0_i32_0 = arith.constant 0 : i32
    %c0_i32_1 = arith.constant 0 : i32
    return %c0_i32, %c0_i32_0 : i32, i32
  }
  func.func @transform_3(%arg0: i32) -> (i32, i32) {
    %c0_i32 = arith.constant 0 : i32
    %c0_i32_0 = arith.constant 0 : i32
    %c0_i32_1 = arith.constant 0 : i32
    return %c0_i32, %c0_i32_0 : i32, i32
  }
  func.func @transform_4(%arg0: i32) -> (i32, i32) {
    %c0_i32 = arith.constant 0 : i32
    %c0_i32_0 = arith.constant 0 : i32
    %c0_i32_1 = arith.constant 0 : i32
    return %c0_i32, %c0_i32_0 : i32, i32
  }
  func.func @transform_5(%arg0: i32) -> (i32, i32) {
    %c0_i32 = arith.constant 0 : i32
    %c0_i32_0 = arith.constant 0 : i32
    return %arg0, %c0_i32 : i32, i32
  }
}

</mosaic_0001>

<bundles_post_ra>
// kernel: tpu_custom_call.1
= control target key start
LH: loop header
LB: loop body
LE: loop exit
PB: predicated region body
PF: predicated region fallthrough
CT: control target
= control target key end

     0   :  { %10 = vsyncpa [#allocation3], 0  ;;  %s3204_s0 = inlined_call_operand.hbm [shape: bf16[8,3072], index: 0, kind: input, shape index: {}]   ;;  %s3205_s1 = inlined_call_operand.hbm [shape: bf16[3072,128], index: 1, kind: input, shape index: {}]   ;;  %s3206_s2 = inlined_call_operand.vmem [shape: f32[1,128], index: 2, kind: input, shape index: {}]   ;;  %s3207_s3 = inlined_call_operand.hbm [shape: bf16[128,128], index: 3, kind: input, shape index: {}]   ;;  %s3208_s4 = inlined_call_operand.vmem [shape: f32[1,128], index: 4, kind: input, shape index: {}]   ;;  %s3209_s5 = inlined_call_operand.hbm [shape: bf16[8,128], index: 5, kind: output, shape index: {}]  }
   0x1   :  { %11 = vsyncpa [#allocation6], 0 }
   0x2   :  { %12 = vsyncpa [#allocation4], 0  ;;  %s3148_s18 = smov [#allocation5]  }
   0x3   :  { %s28_s19 = sshll.u32 %s3148_s18, 4  ;;  %s29_s19 = int_to_ptr.vmem [resolvable:$true] %s28_s19 }
   0x4   :  { %s3070_s20 = scalar_lea.vmem %s29_s19, 24576  ;;  %p3075_p1 = scmp.lt.s32.totalorder %s29_s19, %s29_s19 }
   0x5   :  { %p3071_p0 = scmp.ne.s32.totalorder %s29_s19, %s3070_s20  ;;  %p3076_p2 = scmp.lt.s32.totalorder %s3070_s20, %s3070_s20 }
   0x7   :  { %p3077_p3 = por %p3076_p2, %p3075_p1 }
   0x9   :  { %p3078_p4 = pnand %p3077_p3, %p3071_p0 }
   0xb   :  { %3081 = shalt.err (!%p3078_p4)
}
   0xc   :  { %s3149_s21 = smov 64   ;;  %s3150_s22 = smov 4  }
   0xd   :  { %34 = dma.hbm_to_vmem [thread:$0]  %s3205_s1, 24576, %s29_s19, [#allocation6], %s3149_s21, %s3149_s21, %s3150_s22  }
   0xe   :  { %s3151_s25 = smov [#allocation2]   ;;  %s3152_s27 = smov [#allocation7]  }
   0xf   :  { %s19_s26 = sshll.u32 %s3151_s25, 4  ;;  %s42_s28 = sshll.u32 %s3152_s27, 4  ;;  %s20_s26 = int_to_ptr.vmem [resolvable:$true] %s19_s26  ;;  %s43_s28 = int_to_ptr.vmem [resolvable:$true] %s42_s28 }
  0x10   :  { %s3090_s29 = scalar_lea.vmem %s20_s26, 1536  ;;  %p3095_p6 = scmp.lt.s32.totalorder %s20_s26, %s20_s26 }
  0x11   :  { %p3091_p5 = scmp.ne.s32.totalorder %s20_s26, %s3090_s29  ;;  %p3096_p7 = scmp.lt.s32.totalorder %s3090_s29, %s3090_s29 }
  0x13   :  { %p3097_p8 = por %p3096_p7, %p3095_p6 }
  0x15   :  { %p3098_p9 = pnand %p3097_p8, %p3091_p5 }
  0x17   :  { %3101 = shalt.err (!%p3098_p9)
}
  0x18   :  { %22 = dma.hbm_to_vmem [thread:$0]  %s3204_s0, 1536, %s20_s26, [#allocation3]  }
  0x19   :  { %s3110_s7 = scalar_lea.vmem %s43_s28, 1024  ;;  %p3115_p11 = scmp.lt.s32.totalorder %s43_s28, %s43_s28 }
  0x1a   :  { %p3111_p10 = scmp.ne.s32.totalorder %s43_s28, %s3110_s7  ;;  %p3116_p12 = scmp.lt.s32.totalorder %s3110_s7, %s3110_s7 }
  0x1c   :  { %p3117_p13 = por %p3116_p12, %p3115_p11 }
  0x1e   :  { %p3118_p0 = pnand %p3117_p13, %p3111_p10 }
  0x20   :  { %3121 = shalt.err (!%p3118_p0)
}
  0x21   :  { %48 = dma.hbm_to_vmem [thread:$0]  %s3207_s3, 1024, %s43_s28, [#allocation6], %s3149_s21, %s3149_s21, %s3150_s22  }
  0x22   :  { %3142 = dma.done.wait [#allocation3], 1536  }
  0x23   :  { %3143 = vsyncadd [#allocation3], 4294965760 }
  0x24   :  { %3144 = dma.done.wait [#allocation6], 25600  }
  0x25   :  { %3145 = vsyncadd [#allocation6], 4294941696  ;;  %v2838_v0 = vld [vmem:[#allocation5 + $0x78] sm:$0xff]   ;;  %v2842_v4 = vld [vmem:[#allocation5 + $0x70] sm:$0xff]   ;;  %vm3154_vm0 = vmmov 0   ;;  %s3155_s10 = smov [#allocation8]  }
  0x26   :  { %v2839_v1 = vld [vmem:[#allocation5 + $0xf8] sm:$0xff]   ;;  %2537 = vmatprep.subr.bf16.mxu0 %v2838_v0  ;;  %v2843_v5 = vld [vmem:[#allocation5 + $0xf0] sm:$0xff]   ;;  %v2846_v8 = vld [vmem:[#allocation5 + $0x68] sm:$0xff]   ;;  %s2301_s11 = sshll.u32 %s3155_s10, 4  ;;  %s2302_s11 = int_to_ptr.vmem [resolvable:$true] %s2301_s11 }
  0x27   :  { %v2840_v2 = vld [vmem:[#allocation5 + $0x38] sm:$0xff]   ;;  %2559 = vmatprep.subr.bf16.mxu1 %v2839_v1  ;;  %v2844_v6 = vld [vmem:[#allocation5 + $0x30] sm:$0xff]   ;;  %v2847_v9 = vld [vmem:[#allocation5 + $0xe8] sm:$0xff]   ;;  %s3122_s12 = scalar_lea.vmem %s2302_s11, 64  ;;  %p3127_p2 = scmp.lt.s32.totalorder %s2302_s11, %s2302_s11 }
  0x28   :  { %v2841_v3 = vld [vmem:[#allocation5 + $0xb8] sm:$0xff]   ;;  %2538 = vmatpush3.bf16.msra.mxu0 %v2840_v2  ;;  %v2845_v7 = vld [vmem:[#allocation5 + $0xb0] sm:$0xff]   ;;  %v2848_v10 = vld [vmem:[#allocation5 + $0x28] sm:$0xff]   ;;  %p3123_p1 = scmp.ne.s32.totalorder %s2302_s11, %s3122_s12  ;;  %p3128_p3 = scmp.lt.s32.totalorder %s3122_s12, %s3122_s12 }
  0x29   :  { %2560 = vmatpush3.bf16.msra.mxu1 %v2841_v3  ;;  %2539 = vmatprep.subr.bf16.mxu0 %v2842_v4  ;;  %v2849_v11 = vld [vmem:[#allocation5 + $0xa8] sm:$0xff]   ;;  %v2850_v12 = vld [vmem:[#allocation5 + $0x60] sm:$0xff]   ;;  %v2854_v16 = vld [vmem:[#allocation5 + $0x58] sm:$0xff]  }
  0x2a   :  { %2561 = vmatprep.subr.bf16.mxu1 %v2843_v5  ;;  %v2851_v13 = vld [vmem:[#allocation5 + $0xe0] sm:$0xff]   ;;  %v2855_v17 = vld [vmem:[#allocation5 + $0xd8] sm:$0xff]   ;;  %v2858_v20 = vld [vmem:[#allocation5 + $0x50] sm:$0xff]   ;;  %p3129_p4 = por %p3128_p3, %p3127_p2 }
  0x2b   :  { %v2852_v14 = vld [vmem:[#allocation5 + $0x20] sm:$0xff]   ;;  %v2856_v18 = vld [vmem:[#allocation5 + $0x18] sm:$0xff]   ;;  %v2859_v21 = vld [vmem:[#allocation5 + $0xd0] sm:$0xff]  }
  0x2c   :  { %2540 = vmatpush3.bf16.msra.mxu0 %v2844_v6  ;;  %v2853_v15 = vld [vmem:[#allocation5 + $0xa0] sm:$0xff]   ;;  %v2857_v19 = vld [vmem:[#allocation5 + $0x98] sm:$0xff]   ;;  %v2860_v22 = vld [vmem:[#allocation5 + $0x10] sm:$0xff]   ;;  %p3130_p5 = pnand %p3129_p4, %p3123_p1 }
  0x2d   :  { %2562 = vmatpush3.bf16.msra.mxu1 %v2845_v7  ;;  %2541 = vmatprep.subr.bf16.mxu0 %v2846_v8  ;;  %v2861_v23 = vld [vmem:[#allocation5 + $0x90] sm:$0xff]   ;;  %v2862_v24 = vld [vmem:[#allocation5 + $0x48] sm:$0xff]   ;;  %v2866_v28 = vld [vmem:[#allocation5 + $0x40] sm:$0xff]  }
  0x2e   :  { %2563 = vmatprep.subr.bf16.mxu1 %v2847_v9  ;;  %v2863_v25 = vld [vmem:[#allocation5 + $0xc8] sm:$0xff]   ;;  %v2867_v29 = vld [vmem:[#allocation5 + $0xc0] sm:$0xff]   ;;  %v2874_v38 = vld [vmem:[#allocation5 + $0x178] sm:$0xff]  }
  0x2f   :  { %v2864_v26 = vld [vmem:[#allocation5 + $0x8] sm:$0xff]   ;;  %v2868_v30 = vld [vmem:[#allocation5] sm:$0xff]   ;;  %v2875_v39 = vld [vmem:[#allocation5 + $0x1f8] sm:$0xff]  }
  0x30   :  { %2542 = vmatpush3.bf16.msra.mxu0 %v2848_v10  ;;  %v2865_v27 = vld [vmem:[#allocation5 + $0x88] sm:$0xff]   ;;  %v2869_v31 = vld [vmem:[#allocation5 + $0x80] sm:$0xff]   ;;  %v2876_v40 = vld [vmem:[#allocation5 + $0x138] sm:$0xff]  }
  0x31   :  { %2564 = vmatpush3.bf16.msra.mxu1 %v2849_v11  ;;  %2543 = vmatprep.subr.bf16.mxu0 %v2850_v12  ;;  %v61_v32 = vld [vmem:[#allocation2] sm:$0xff]  ;;  %v62_v33 = vld [vmem:[#allocation2 + $0x8] sm:$0xff]  ;;  %v2877_v41 = vld [vmem:[#allocation5 + $0x1b8] sm:$0xff]  }
  0x32   :  { %2565 = vmatprep.subr.bf16.mxu1 %v2851_v13  ;;  %v2312_v34 = vcombine.low %v61_v32, %v61_v32  ;;  %v2313_v35 = vcombine.high %v61_v32, %v61_v32  ;;  %v2314_v36 = vcombine.low %v62_v33, %v62_v33  ;;  %v2315_v37 = vcombine.high %v62_v33, %v62_v33  ;;  %v2878_v42 = vld [vmem:[#allocation5 + $0x170] sm:$0xff]   ;;  %v2882_v46 = vld [vmem:[#allocation5 + $0x168] sm:$0xff]   ;;  %v2886_v50 = vld [vmem:[#allocation5 + $0x160] sm:$0xff]  }
  0x33   :  { %v2879_v43 = vld [vmem:[#allocation5 + $0x1f0] sm:$0xff]   ;;  %v2883_v47 = vld [vmem:[#allocation5 + $0x1e8] sm:$0xff]   ;;  %v2887_v51 = vld [vmem:[#allocation5 + $0x1e0] sm:$0xff]  }
  0x34   :  { %2544 = vmatpush3.bf16.msra.mxu0 %v2852_v14  ;;  %1732 = vmatprep.mubr.bf16.mxu0 %v2313_v35  ;;  %v2880_v44 = vld [vmem:[#allocation5 + $0x130] sm:$0xff]   ;;  %v2884_v48 = vld [vmem:[#allocation5 + $0x128] sm:$0xff]   ;;  %v2888_v52 = vld [vmem:[#allocation5 + $0x120] sm:$0xff]  }
  0x35   :  { %2566 = vmatpush3.bf16.msra.mxu1 %v2853_v15  ;;  %2545 = vmatprep.subr.bf16.mxu0 %v2854_v16  ;;  %v2881_v45 = vld [vmem:[#allocation5 + $0x1b0] sm:$0xff]   ;;  %v2885_v49 = vld [vmem:[#allocation5 + $0x1a8] sm:$0xff]   ;;  %v2889_v53 = vld [vmem:[#allocation5 + $0x1a0] sm:$0xff]  }
  0x36   :  { %2567 = vmatprep.subr.bf16.mxu1 %v2855_v17  ;;  %1772 = vmatprep.mubr.bf16.mxu1 %v2315_v37  ;;  %v2890_v54 = vld [vmem:[#allocation5 + $0x158] sm:$0xff]   ;;  %v2894_v58 = vld [vmem:[#allocation5 + $0x150] sm:$0xff]   ;;  %v2898_v62 = vld [vmem:[#allocation5 + $0x148] sm:$0xff]  }
  0x37   :  { %v2891_v55 = vld [vmem:[#allocation5 + $0x1d8] sm:$0xff]   ;;  %v2895_v59 = vld [vmem:[#allocation5 + $0x1d0] sm:$0xff]   ;;  %v2899_v63 = vld [vmem:[#allocation5 + $0x1c8] sm:$0xff]  }
  0x38   :  { %2546 = vmatpush3.bf16.msra.mxu0 %v2856_v18  ;;  %v2892_v56 = vld [vmem:[#allocation5 + $0x118] sm:$0xff]   ;;  %v2896_v60 = vld [vmem:[#allocation5 + $0x110] sm:$0xff]   ;;  %v2900_v0 = vld [vmem:[#allocation5 + $0x108] sm:$0xff]  }
  0x39   :  { %2568 = vmatpush3.bf16.msra.mxu1 %v2857_v19  ;;  %2547 = vmatprep.subr.bf16.mxu0 %v2858_v20  ;;  %v2893_v57 = vld [vmem:[#allocation5 + $0x198] sm:$0xff]   ;;  %v2897_v61 = vld [vmem:[#allocation5 + $0x190] sm:$0xff]   ;;  %v2901_v1 = vld [vmem:[#allocation5 + $0x188] sm:$0xff]  }
  0x3a   :  { %2569 = vmatprep.subr.bf16.mxu1 %v2859_v21  ;;  %v2902_v2 = vld [vmem:[#allocation5 + $0x140] sm:$0xff]   ;;  %v63_v6 = vld [vmem:[#allocation2 + $0x10] sm:$0xff]  ;;  %v64_v9 = vld [vmem:[#allocation2 + $0x18] sm:$0xff] }
  0x3b   :  { %v2903_v3 = vld [vmem:[#allocation5 + $0x1c0] sm:$0xff]   ;;  %v2316_v7 = vcombine.low %v63_v6, %v63_v6  ;;  %v2317_v8 = vcombine.high %v63_v6, %v63_v6  ;;  %v2318_v10 = vcombine.low %v64_v9, %v64_v9  ;;  %v2319_v11 = vcombine.high %v64_v9, %v64_v9  ;;  %v2910_v12 = vld [vmem:[#allocation5 + $0x278] sm:$0xff]   ;;  %v2914_v16 = vld [vmem:[#allocation5 + $0x270] sm:$0xff]  }
  0x3c   :  { %2548 = vmatpush3.bf16.msra.mxu0 %v2860_v22  ;;  %v2904_v4 = vld [vmem:[#allocation5 + $0x100] sm:$0xff]   ;;  %v2911_v13 = vld [vmem:[#allocation5 + $0x2f8] sm:$0xff]   ;;  %v2915_v17 = vld [vmem:[#allocation5 + $0x2f0] sm:$0xff]  }
  0x3d   :  { %2570 = vmatpush3.bf16.msra.mxu1 %v2861_v23  ;;  %2549 = vmatprep.subr.bf16.mxu0 %v2862_v24  ;;  %v2905_v5 = vld [vmem:[#allocation5 + $0x180] sm:$0xff]   ;;  %v2912_v14 = vld [vmem:[#allocation5 + $0x238] sm:$0xff]   ;;  %v2916_v18 = vld [vmem:[#allocation5 + $0x230] sm:$0xff]  }
  0x3e   :  { %2571 = vmatprep.subr.bf16.mxu1 %v2863_v25  ;;  %v2913_v15 = vld [vmem:[#allocation5 + $0x2b8] sm:$0xff]   ;;  %v2917_v19 = vld [vmem:[#allocation5 + $0x2b0] sm:$0xff]   ;;  %v2918_v20 = vld [vmem:[#allocation5 + $0x268] sm:$0xff]  }
  0x3f   :  { %v2919_v21 = vld [vmem:[#allocation5 + $0x2e8] sm:$0xff]   ;;  %v2922_v24 = vld [vmem:[#allocation5 + $0x260] sm:$0xff]   ;;  %v2930_v32 = vld [vmem:[#allocation5 + $0x250] sm:$0xff]  }
  0x40   :  { %2550 = vmatpush3.bf16.msra.mxu0 %v2864_v26  ;;  %v2920_v22 = vld [vmem:[#allocation5 + $0x228] sm:$0xff]   ;;  %v2923_v25 = vld [vmem:[#allocation5 + $0x2e0] sm:$0xff]   ;;  %v2931_v33 = vld [vmem:[#allocation5 + $0x2d0] sm:$0xff]  }
  0x41   :  { %2572 = vmatpush3.bf16.msra.mxu1 %v2865_v27  ;;  %2551 = vmatprep.subr.bf16.mxu0 %v2866_v28  ;;  %v2921_v23 = vld [vmem:[#allocation5 + $0x2a8] sm:$0xff]   ;;  %v2924_v26 = vld [vmem:[#allocation5 + $0x220] sm:$0xff]   ;;  %v2926_v28 = vld [vmem:[#allocation5 + $0x258] sm:$0xff]  }
  0x42   :  { %2573 = vmatprep.subr.bf16.mxu1 %v2867_v29  ;;  %v2925_v27 = vld [vmem:[#allocation5 + $0x2a0] sm:$0xff]   ;;  %v2927_v29 = vld [vmem:[#allocation5 + $0x2d8] sm:$0xff]   ;;  %v2933_v35 = vld [vmem:[#allocation5 + $0x290] sm:$0xff]  }
  0x43   :  { %v2935_v37 = vld [vmem:[#allocation5 + $0x2c8] sm:$0xff]   ;;  %v2966_v6 = vld [vmem:[#allocation5 + $0x350] sm:$0xff]  }
  0x44   :  { %2552 = vmatpush3.bf16.msra.mxu0 %v2868_v30  ;;  %v2928_v30 = vld [vmem:[#allocation5 + $0x218] sm:$0xff]   ;;  %v2969_v9 = vld [vmem:[#allocation5 + $0x390] sm:$0xff]  }
  0x45   :  { %2574 = vmatpush3.bf16.msra.mxu1 %v2869_v31  ;;  %2581 = vmatprep.subr.bf16.mxu0 %v2874_v38  ;;  %v2929_v31 = vld [vmem:[#allocation5 + $0x298] sm:$0xff]   ;;  %v2936_v38 = vld [vmem:[#allocation5 + $0x208] sm:$0xff]  }
  0x46   :  { %2603 = vmatprep.subr.bf16.mxu1 %v2875_v39  ;;  %v2937_v39 = vld [vmem:[#allocation5 + $0x288] sm:$0xff]  }
  0x47   :  { %1733 = vmatmul.mubr.bf16.vlgmr.msra.gmra.mxu0 %v2312_v34  ;;  %v2932_v34 = vld [vmem:[#allocation5 + $0x210] sm:$0xff]  }
  0x48   :  { %1773 = vmatmul.mubr.bf16.vlgmr.msra.gmra.mxu1 %v2314_v36  ;;  %2582 = vmatpush3.bf16.msra.mxu0 %v2876_v40  ;;  %v2934_v36 = vld [vmem:[#allocation5 + $0x248] sm:$0xff]   ;;  %v2938_v40 = vld [vmem:[#allocation5 + $0x240] sm:$0xff]  }
  0x49   :  { %2604 = vmatpush3.bf16.msra.mxu1 %v2877_v41  ;;  %2583 = vmatprep.subr.bf16.mxu0 %v2878_v42  ;;  %v2939_v41 = vld [vmem:[#allocation5 + $0x2c0] sm:$0xff]  }
  0x4a   :  { %2605 = vmatprep.subr.bf16.mxu1 %v2879_v43  ;;  %1812 = vmatprep.mubr.bf16.mxu0 %v2317_v8  ;;  %v2940_v42 = vld [vmem:[#allocation5 + $0x200] sm:$0xff]   ;;  %v2968_v8 = vld [vmem:[#allocation5 + $0x310] sm:$0xff]  }
  0x4b   :  { %1852 = vmatprep.mubr.bf16.mxu1 %v2319_v11  ;;  %v2941_v43 = vld [vmem:[#allocation5 + $0x280] sm:$0xff]   ;;  %v2971_v11 = vld [vmem:[#allocation5 + $0x3c8] sm:$0xff]  }
  0x4c   :  { %2584 = vmatpush3.bf16.msra.mxu0 %v2880_v44  ;;  %v65_v44 = vld [vmem:[#allocation2 + $0x20] sm:$0xff] }
  0x4d   :  { %2606 = vmatpush3.bf16.msra.mxu1 %v2881_v45  ;;  %2585 = vmatprep.subr.bf16.mxu0 %v2882_v46  ;;  %v66_v45 = vld [vmem:[#allocation2 + $0x28] sm:$0xff]  ;;  %v2320_v46 = vcombine.low %v65_v44, %v65_v44 }
  0x4e   :  { %2607 = vmatprep.subr.bf16.mxu1 %v2883_v47  ;;  %v2321_v47 = vcombine.high %v65_v44, %v65_v44  ;;  %v3002_v44 = vld [vmem:[#allocation5 + $0x450] sm:$0xff]  }
  0x50   :  { %2586 = vmatpush3.bf16.msra.mxu0 %v2884_v48  ;;  %v2322_v48 = vcombine.low %v66_v45, %v66_v45 }
  0x51   :  { %2608 = vmatpush3.bf16.msra.mxu1 %v2885_v49  ;;  %2587 = vmatprep.subr.bf16.mxu0 %v2886_v50  ;;  %v2323_v49 = vcombine.high %v66_v45, %v66_v45  ;;  %v2946_v50 = vld [vmem:[#allocation5 + $0x378] sm:$0xff]   ;;  %v3003_v45 = vld [vmem:[#allocation5 + $0x4d0] sm:$0xff]  }
  0x52   :  { %2609 = vmatprep.subr.bf16.mxu1 %v2887_v51  ;;  %v2947_v51 = vld [vmem:[#allocation5 + $0x3f8] sm:$0xff]  }
  0x54   :  { %2588 = vmatpush3.bf16.msra.mxu0 %v2888_v52  ;;  %v2948_v52 = vld [vmem:[#allocation5 + $0x338] sm:$0xff]  }
  0x55   :  { %2610 = vmatpush3.bf16.msra.mxu1 %v2889_v53  ;;  %2589 = vmatprep.subr.bf16.mxu0 %v2890_v54  ;;  %v2949_v53 = vld [vmem:[#allocation5 + $0x3b8] sm:$0xff]   ;;  %v2950_v54 = vld [vmem:[#allocation5 + $0x370] sm:$0xff]  }
  0x56   :  { %2611 = vmatprep.subr.bf16.mxu1 %v2891_v55  ;;  %v2951_v55 = vld [vmem:[#allocation5 + $0x3f0] sm:$0xff]  }
  0x58   :  { %2590 = vmatpush3.bf16.msra.mxu0 %v2892_v56  ;;  %v2952_v56 = vld [vmem:[#allocation5 + $0x330] sm:$0xff]  }
  0x59   :  { %2612 = vmatpush3.bf16.msra.mxu1 %v2893_v57  ;;  %2591 = vmatprep.subr.bf16.mxu0 %v2894_v58  ;;  %v2953_v57 = vld [vmem:[#allocation5 + $0x3b0] sm:$0xff]   ;;  %v2954_v58 = vld [vmem:[#allocation5 + $0x368] sm:$0xff]  }
  0x5a   :  { %2613 = vmatprep.subr.bf16.mxu1 %v2895_v59  ;;  %v2955_v59 = vld [vmem:[#allocation5 + $0x3e8] sm:$0xff]  }
  0x5c   :  { %2592 = vmatpush3.bf16.msra.mxu0 %v2896_v60  ;;  %v2956_v60 = vld [vmem:[#allocation5 + $0x328] sm:$0xff]  }
  0x5d   :  { %2614 = vmatpush3.bf16.msra.mxu1 %v2897_v61  ;;  %2593 = vmatprep.subr.bf16.mxu0 %v2898_v62  ;;  %v2957_v61 = vld [vmem:[#allocation5 + $0x3a8] sm:$0xff]   ;;  %v2958_v62 = vld [vmem:[#allocation5 + $0x360] sm:$0xff]  }
  0x5e   :  { %2615 = vmatprep.subr.bf16.mxu1 %v2899_v63  ;;  %v2959_v63 = vld [vmem:[#allocation5 + $0x3e0] sm:$0xff]  }
  0x60   :  { %2594 = vmatpush3.bf16.msra.mxu0 %v2900_v0  ;;  %v2960_v0 = vld [vmem:[#allocation5 + $0x320] sm:$0xff]  }
  0x61   :  { %2616 = vmatpush3.bf16.msra.mxu1 %v2901_v1  ;;  %2595 = vmatprep.subr.bf16.mxu0 %v2902_v2  ;;  %v2961_v1 = vld [vmem:[#allocation5 + $0x3a0] sm:$0xff]   ;;  %v2962_v2 = vld [vmem:[#allocation5 + $0x358] sm:$0xff]  }
  0x62   :  { %2617 = vmatprep.subr.bf16.mxu1 %v2903_v3  ;;  %v2963_v3 = vld [vmem:[#allocation5 + $0x3d8] sm:$0xff]  }
  0x64   :  { %2596 = vmatpush3.bf16.msra.mxu0 %v2904_v4  ;;  %v2964_v4 = vld [vmem:[#allocation5 + $0x318] sm:$0xff]  }
  0x65   :  { %2618 = vmatpush3.bf16.msra.mxu1 %v2905_v5  ;;  %2625 = vmatprep.subr.bf16.mxu0 %v2910_v12  ;;  %v2965_v5 = vld [vmem:[#allocation5 + $0x398] sm:$0xff]   ;;  %v2972_v12 = vld [vmem:[#allocation5 + $0x308] sm:$0xff]  }
  0x66   :  { %2647 = vmatprep.subr.bf16.mxu1 %v2911_v13  ;;  %v2973_v13 = vld [vmem:[#allocation5 + $0x388] sm:$0xff]  }
  0x67   :  { %1813 = vmatmul.mubr.bf16.vlgmr.msra.gmra.mxu0 %v2316_v7  ;;  %v2967_v7 = vld [vmem:[#allocation5 + $0x3d0] sm:$0xff]  }
  0x68   :  { %1853 = vmatmul.mubr.bf16.vlgmr.msra.gmra.mxu1 %v2318_v10  ;;  %2626 = vmatpush3.bf16.msra.mxu0 %v2912_v14  ;;  %v2970_v10 = vld [vmem:[#allocation5 + $0x348] sm:$0xff]   ;;  %v2974_v14 = vld [vmem:[#allocation5 + $0x340] sm:$0xff]  }
  0x69   :  { %2648 = vmatpush3.bf16.msra.mxu1 %v2913_v15  ;;  %2627 = vmatprep.subr.bf16.mxu0 %v2914_v16  ;;  %v2975_v15 = vld [vmem:[#allocation5 + $0x3c0] sm:$0xff]  }
  0x6a   :  { %2649 = vmatprep.subr.bf16.mxu1 %v2915_v17  ;;  %1892 = vmatprep.mubr.bf16.mxu0 %v2321_v47  ;;  %v2976_v16 = vld [vmem:[#allocation5 + $0x300] sm:$0xff]   ;;  %v3005_v47 = vld [vmem:[#allocation5 + $0x490] sm:$0xff]  }
  0x6b   :  { %1932 = vmatprep.mubr.bf16.mxu1 %v2323_v49  ;;  %v2977_v17 = vld [vmem:[#allocation5 + $0x380] sm:$0xff]   ;;  %v3007_v49 = vld [vmem:[#allocation5 + $0x4c8] sm:$0xff]  }
  0x6c   :  { %2628 = vmatpush3.bf16.msra.mxu0 %v2916_v18  ;;  %v67_v18 = vld [vmem:[#allocation2 + $0x30] sm:$0xff] }
  0x6d   :  { %2650 = vmatpush3.bf16.msra.mxu1 %v2917_v19  ;;  %2629 = vmatprep.subr.bf16.mxu0 %v2918_v20  ;;  %v68_v19 = vld [vmem:[#allocation2 + $0x38] sm:$0xff]  ;;  %v2324_v20 = vcombine.low %v67_v18, %v67_v18 }
  0x6e   :  { %2651 = vmatprep.subr.bf16.mxu1 %v2919_v21  ;;  %v2325_v21 = vcombine.high %v67_v18, %v67_v18  ;;  %v3038_v18 = vld [vmem:[#allocation5 + $0x550] sm:$0xff]  }
  0x70   :  { %2630 = vmatpush3.bf16.msra.mxu0 %v2920_v22  ;;  %v2326_v22 = vcombine.low %v68_v19, %v68_v19 }
  0x71   :  { %2652 = vmatpush3.bf16.msra.mxu1 %v2921_v23  ;;  %2631 = vmatprep.subr.bf16.mxu0 %v2922_v24  ;;  %v2982_v23 = vld [vmem:[#allocation5 + $0x478] sm:$0xff]   ;;  %v2327_v24 = vcombine.high %v68_v19, %v68_v19  ;;  %v3039_v19 = vld [vmem:[#allocation5 + $0x5d0] sm:$0xff]  }
  0x72   :  { %2653 = vmatprep.subr.bf16.mxu1 %v2923_v25  ;;  %v2983_v25 = vld [vmem:[#allocation5 + $0x4f8] sm:$0xff]  }
  0x74   :  { %2632 = vmatpush3.bf16.msra.mxu0 %v2924_v26  ;;  %v2984_v26 = vld [vmem:[#allocation5 + $0x438] sm:$0xff]  }
  0x75   :  { %2654 = vmatpush3.bf16.msra.mxu1 %v2925_v27  ;;  %2633 = vmatprep.subr.bf16.mxu0 %v2926_v28  ;;  %v2985_v27 = vld [vmem:[#allocation5 + $0x4b8] sm:$0xff]   ;;  %v2986_v28 = vld [vmem:[#allocation5 + $0x470] sm:$0xff]  }
  0x76   :  { %2655 = vmatprep.subr.bf16.mxu1 %v2927_v29  ;;  %v2987_v29 = vld [vmem:[#allocation5 + $0x4f0] sm:$0xff]  }
  0x78   :  { %2634 = vmatpush3.bf16.msra.mxu0 %v2928_v30  ;;  %v2988_v30 = vld [vmem:[#allocation5 + $0x430] sm:$0xff]  }
  0x79   :  { %2656 = vmatpush3.bf16.msra.mxu1 %v2929_v31  ;;  %2635 = vmatprep.subr.bf16.mxu0 %v2930_v32  ;;  %v2989_v31 = vld [vmem:[#allocation5 + $0x4b0] sm:$0xff]   ;;  %v2990_v32 = vld [vmem:[#allocation5 + $0x468] sm:$0xff]  }
  0x7a   :  { %2657 = vmatprep.subr.bf16.mxu1 %v2931_v33  ;;  %v2991_v33 = vld [vmem:[#allocation5 + $0x4e8] sm:$0xff]  }
  0x7c   :  { %2636 = vmatpush3.bf16.msra.mxu0 %v2932_v34  ;;  %v2992_v34 = vld [vmem:[#allocation5 + $0x428] sm:$0xff]  }
  0x7d   :  { %2658 = vmatpush3.bf16.msra.mxu1 %v2933_v35  ;;  %2637 = vmatprep.subr.bf16.mxu0 %v2934_v36  ;;  %v2993_v35 = vld [vmem:[#allocation5 + $0x4a8] sm:$0xff]   ;;  %v2994_v36 = vld [vmem:[#allocation5 + $0x460] sm:$0xff]  }
  0x7e   :  { %2659 = vmatprep.subr.bf16.mxu1 %v2935_v37  ;;  %v2995_v37 = vld [vmem:[#allocation5 + $0x4e0] sm:$0xff]  }
  0x80   :  { %2638 = vmatpush3.bf16.msra.mxu0 %v2936_v38  ;;  %v2996_v38 = vld [vmem:[#allocation5 + $0x420] sm:$0xff]  }
  0x81   :  { %2660 = vmatpush3.bf16.msra.mxu1 %v2937_v39  ;;  %2639 = vmatprep.subr.bf16.mxu0 %v2938_v40  ;;  %v2997_v39 = vld [vmem:[#allocation5 + $0x4a0] sm:$0xff]   ;;  %v2998_v40 = vld [vmem:[#allocation5 + $0x458] sm:$0xff]  }
  0x82   :  { %2661 = vmatprep.subr.bf16.mxu1 %v2939_v41  ;;  %v2999_v41 = vld [vmem:[#allocation5 + $0x4d8] sm:$0xff]  }
  0x84   :  { %2640 = vmatpush3.bf16.msra.mxu0 %v2940_v42  ;;  %v3000_v42 = vld [vmem:[#allocation5 + $0x418] sm:$0xff]  }
  0x85   :  { %2662 = vmatpush3.bf16.msra.mxu1 %v2941_v43  ;;  %2669 = vmatprep.subr.bf16.mxu0 %v2946_v50  ;;  %v3001_v43 = vld [vmem:[#allocation5 + $0x498] sm:$0xff]   ;;  %v3008_v50 = vld [vmem:[#allocation5 + $0x408] sm:$0xff]  }
  0x86   :  { %2691 = vmatprep.subr.bf16.mxu1 %v2947_v51  ;;  %v3009_v51 = vld [vmem:[#allocation5 + $0x488] sm:$0xff]  }
  0x87   :  { %1893 = vmatmul.mubr.bf16.vlgmr.msra.gmra.mxu0 %v2320_v46  ;;  %v3004_v46 = vld [vmem:[#allocation5 + $0x410] sm:$0xff]  }
  0x88   :  { %1933 = vmatmul.mubr.bf16.vlgmr.msra.gmra.mxu1 %v2322_v48  ;;  %2670 = vmatpush3.bf16.msra.mxu0 %v2948_v52  ;;  %v3006_v48 = vld [vmem:[#allocation5 + $0x448] sm:$0xff]   ;;  %v3010_v52 = vld [vmem:[#allocation5 + $0x440] sm:$0xff]  }
  0x89   :  { %2692 = vmatpush3.bf16.msra.mxu1 %v2949_v53  ;;  %2671 = vmatprep.subr.bf16.mxu0 %v2950_v54  ;;  %v3011_v53 = vld [vmem:[#allocation5 + $0x4c0] sm:$0xff]  }
  0x8a   :  { %2693 = vmatprep.subr.bf16.mxu1 %v2951_v55  ;;  %1972 = vmatprep.mubr.bf16.mxu0 %v2325_v21  ;;  %v3012_v54 = vld [vmem:[#allocation5 + $0x400] sm:$0xff]   ;;  %v3041_v21 = vld [vmem:[#allocation5 + $0x590] sm:$0xff]  }
  0x8b   :  { %2012 = vmatprep.mubr.bf16.mxu1 %v2327_v24  ;;  %v3013_v55 = vld [vmem:[#allocation5 + $0x480] sm:$0xff]   ;;  %v3044_v24 = vld [vmem:[#allocation5 + $0x508] sm:$0xff]  }
  0x8c   :  { %2672 = vmatpush3.bf16.msra.mxu0 %v2952_v56  ;;  %v69_v56 = vld [vmem:[#allocation2 + $0x40] sm:$0xff] }
  0x8d   :  { %2694 = vmatpush3.bf16.msra.mxu1 %v2953_v57  ;;  %2673 = vmatprep.subr.bf16.mxu0 %v2954_v58  ;;  %v2328_v57 = vcombine.low %v69_v56, %v69_v56  ;;  %v2329_v58 = vcombine.high %v69_v56, %v69_v56 }
  0x8e   :  { %2695 = vmatprep.subr.bf16.mxu1 %v2955_v59  ;;  %v70_v59 = vld [vmem:[#allocation2 + $0x48] sm:$0xff] }
  0x90   :  { %2674 = vmatpush3.bf16.msra.mxu0 %v2956_v60  ;;  %v2330_v60 = vcombine.low %v70_v59, %v70_v59 }
  0x91   :  { %2696 = vmatpush3.bf16.msra.mxu1 %v2957_v61  ;;  %2675 = vmatprep.subr.bf16.mxu0 %v2958_v62  ;;  %v2331_v61 = vcombine.high %v70_v59, %v70_v59  ;;  %v3018_v62 = vld [vmem:[#allocation5 + $0x578] sm:$0xff]  }
  0x92   :  { %2697 = vmatprep.subr.bf16.mxu1 %v2959_v63  ;;  %v3019_v63 = vld [vmem:[#allocation5 + $0x5f8] sm:$0xff]  }
  0x94   :  { %2676 = vmatpush3.bf16.msra.mxu0 %v2960_v0  ;;  %v3020_v0 = vld [vmem:[#allocation5 + $0x538] sm:$0xff]  }
  0x95   :  { %2698 = vmatpush3.bf16.msra.mxu1 %v2961_v1  ;;  %2677 = vmatprep.subr.bf16.mxu0 %v2962_v2  ;;  %v3021_v1 = vld [vmem:[#allocation5 + $0x5b8] sm:$0xff]   ;;  %v3022_v2 = vld [vmem:[#allocation5 + $0x570] sm:$0xff]  }
  0x96   :  { %2699 = vmatprep.subr.bf16.mxu1 %v2963_v3  ;;  %v3023_v3 = vld [vmem:[#allocation5 + $0x5f0] sm:$0xff]  }
  0x98   :  { %2678 = vmatpush3.bf16.msra.mxu0 %v2964_v4  ;;  %v3024_v4 = vld [vmem:[#allocation5 + $0x530] sm:$0xff]  }
  0x99   :  { %2700 = vmatpush3.bf16.msra.mxu1 %v2965_v5  ;;  %2679 = vmatprep.subr.bf16.mxu0 %v2966_v6  ;;  %v3025_v5 = vld [vmem:[#allocation5 + $0x5b0] sm:$0xff]   ;;  %v3026_v6 = vld [vmem:[#allocation5 + $0x568] sm:$0xff]  }
  0x9a   :  { %2701 = vmatprep.subr.bf16.mxu1 %v2967_v7  ;;  %v3027_v7 = vld [vmem:[#allocation5 + $0x5e8] sm:$0xff]  }
  0x9c   :  { %2680 = vmatpush3.bf16.msra.mxu0 %v2968_v8  ;;  %v3028_v8 = vld [vmem:[#allocation5 + $0x528] sm:$0xff]  }
  0x9d   :  { %2702 = vmatpush3.bf16.msra.mxu1 %v2969_v9  ;;  %2681 = vmatprep.subr.bf16.mxu0 %v2970_v10  ;;  %v3029_v9 = vld [vmem:[#allocation5 + $0x5a8] sm:$0xff]   ;;  %v3030_v10 = vld [vmem:[#allocation5 + $0x560] sm:$0xff]  }
  0x9e   :  { %2703 = vmatprep.subr.bf16.mxu1 %v2971_v11  ;;  %v3031_v11 = vld [vmem:[#allocation5 + $0x5e0] sm:$0xff]  }
  0xa0   :  { %2682 = vmatpush3.bf16.msra.mxu0 %v2972_v12  ;;  %v3032_v12 = vld [vmem:[#allocation5 + $0x520] sm:$0xff]  }
  0xa1   :  { %2704 = vmatpush3.bf16.msra.mxu1 %v2973_v13  ;;  %2683 = vmatprep.subr.bf16.mxu0 %v2974_v14  ;;  %v3033_v13 = vld [vmem:[#allocation5 + $0x5a0] sm:$0xff]   ;;  %v3034_v14 = vld [vmem:[#allocation5 + $0x558] sm:$0xff]  }
  0xa2   :  { %2705 = vmatprep.subr.bf16.mxu1 %v2975_v15  ;;  %v3035_v15 = vld [vmem:[#allocation5 + $0x5d8] sm:$0xff]  }
  0xa4   :  { %2684 = vmatpush3.bf16.msra.mxu0 %v2976_v16  ;;  %v3036_v16 = vld [vmem:[#allocation5 + $0x518] sm:$0xff]  }
  0xa5   :  { %2706 = vmatpush3.bf16.msra.mxu1 %v2977_v17  ;;  %2713 = vmatprep.subr.bf16.mxu0 %v2982_v23  ;;  %v3037_v17 = vld [vmem:[#allocation5 + $0x598] sm:$0xff]   ;;  %v3043_v23 = vld [vmem:[#allocation5 + $0x5c8] sm:$0xff]  }
  0xa6   :  { %2735 = vmatprep.subr.bf16.mxu1 %v2983_v25  ;;  %v3045_v25 = vld [vmem:[#allocation5 + $0x588] sm:$0xff]  }
  0xa7   :  { %1973 = vmatmul.mubr.bf16.vlgmr.msra.gmra.mxu0 %v2324_v20  ;;  %v3040_v20 = vld [vmem:[#allocation5 + $0x510] sm:$0xff]  }
  0xa8   :  { %2013 = vmatmul.mubr.bf16.vlgmr.msra.gmra.mxu1 %v2326_v22  ;;  %2714 = vmatpush3.bf16.msra.mxu0 %v2984_v26  ;;  %v3042_v22 = vld [vmem:[#allocation5 + $0x548] sm:$0xff]   ;;  %v3046_v26 = vld [vmem:[#allocation5 + $0x540] sm:$0xff]  }
  0xa9   :  { %2736 = vmatpush3.bf16.msra.mxu1 %v2985_v27  ;;  %2715 = vmatprep.subr.bf16.mxu0 %v2986_v28  ;;  %v3047_v27 = vld [vmem:[#allocation5 + $0x5c0] sm:$0xff]  }
  0xaa   :  { %2737 = vmatprep.subr.bf16.mxu1 %v2987_v29  ;;  %2052 = vmatprep.mubr.bf16.mxu0 %v2329_v58  ;;  %v3048_v28 = vld [vmem:[#allocation5 + $0x500] sm:$0xff]  }
  0xab   :  { %2092 = vmatprep.mubr.bf16.mxu1 %v2331_v61  ;;  %v3049_v29 = vld [vmem:[#allocation5 + $0x580] sm:$0xff]   ;;  %v3059_v61 = vld [vmem:[#allocation7 + $0x10] sm:$0xff]  }
  0xac   :  { %2716 = vmatpush3.bf16.msra.mxu0 %v2988_v30  ;;  %v71_v30 = vld [vmem:[#allocation2 + $0x50] sm:$0xff] }
  0xad   :  { %2738 = vmatpush3.bf16.msra.mxu1 %v2989_v31  ;;  %2717 = vmatprep.subr.bf16.mxu0 %v2990_v32  ;;  %v72_v31 = vld [vmem:[#allocation2 + $0x58] sm:$0xff]  ;;  %v2332_v32 = vcombine.low %v71_v30, %v71_v30 }
  0xae   :  { %2739 = vmatprep.subr.bf16.mxu1 %v2991_v33  ;;  %v2333_v33 = vcombine.high %v71_v30, %v71_v30 }
  0xb0   :  { %2718 = vmatpush3.bf16.msra.mxu0 %v2992_v34  ;;  %v2334_v34 = vcombine.low %v72_v31, %v72_v31 }
  0xb1   :  { %2740 = vmatpush3.bf16.msra.mxu1 %v2993_v35  ;;  %2719 = vmatprep.subr.bf16.mxu0 %v2994_v36  ;;  %v2335_v35 = vcombine.high %v72_v31, %v72_v31 }
  0xb2   :  { %2741 = vmatprep.subr.bf16.mxu1 %v2995_v37 }
  0xb4   :  { %2720 = vmatpush3.bf16.msra.mxu0 %v2996_v38  ;;  %v2311_v38 = vld [vmem:[%s3206_s2] ss:$0 sm:$0xff] }
  0xb5   :  { %2742 = vmatpush3.bf16.msra.mxu1 %v2997_v39  ;;  %2721 = vmatprep.subr.bf16.mxu0 %v2998_v40 }
  0xb6   :  { %2743 = vmatprep.subr.bf16.mxu1 %v2999_v41 }
  0xb8   :  { %2722 = vmatpush3.bf16.msra.mxu0 %v3000_v42 }
  0xb9   :  { %2744 = vmatpush3.bf16.msra.mxu1 %v3001_v43  ;;  %2723 = vmatprep.subr.bf16.mxu0 %v3002_v44 }
  0xba   :  { %2745 = vmatprep.subr.bf16.mxu1 %v3003_v45 }
  0xbc   :  { %2724 = vmatpush3.bf16.msra.mxu0 %v3004_v46 }
  0xbd   :  { %2746 = vmatpush3.bf16.msra.mxu1 %v3005_v47  ;;  %2725 = vmatprep.subr.bf16.mxu0 %v3006_v48 }
  0xbe   :  { %2747 = vmatprep.subr.bf16.mxu1 %v3007_v49  ;;  %v3054_v49 = vld [vmem:[#allocation7 + $0x38] sm:$0xff]  }
  0xc0   :  { %2726 = vmatpush3.bf16.msra.mxu0 %v3008_v50  ;;  %v3153_v50 = vmov 0.0  }
  0xc1   :  { %2748 = vmatpush3.bf16.msra.mxu1 %v3009_v51  ;;  %2727 = vmatprep.subr.bf16.mxu0 %v3010_v52  ;;  %v3055_v51 = vld [vmem:[#allocation7 + $0x30] sm:$0xff]   ;;  %v3056_v52 = vld [vmem:[#allocation7 + $0x28] sm:$0xff]  }
  0xc2   :  { %2749 = vmatprep.subr.bf16.mxu1 %v3011_v53  ;;  %v3057_v53 = vld [vmem:[#allocation7 + $0x20] sm:$0xff]  }
  0xc4   :  { %2728 = vmatpush3.bf16.msra.mxu0 %v3012_v54  ;;  %v3058_v54 = vld [vmem:[#allocation7 + $0x18] sm:$0xff]  }
  0xc5   :  { %2750 = vmatpush3.bf16.msra.mxu1 %v3013_v55  ;;  %2757 = vmatprep.subr.bf16.mxu0 %v3018_v62 }
  0xc6   :  { %2779 = vmatprep.subr.bf16.mxu1 %v3019_v63 }
  0xc7   :  { %2053 = vmatmul.mubr.bf16.vlgmr.msra.gmra.mxu0 %v2328_v57 }
  0xc8   :  { %2093 = vmatmul.mubr.bf16.vlgmr.msra.gmra.mxu1 %v2330_v60  ;;  %2758 = vmatpush3.bf16.msra.mxu0 %v3020_v0 }
  0xc9   :  { %2780 = vmatpush3.bf16.msra.mxu1 %v3021_v1  ;;  %2759 = vmatprep.subr.bf16.mxu0 %v3022_v2 }
  0xca   :  { %2781 = vmatprep.subr.bf16.mxu1 %v3023_v3  ;;  %2132 = vmatprep.mubr.bf16.mxu0 %v2333_v33 }
  0xcb   :  { %2172 = vmatprep.mubr.bf16.mxu1 %v2335_v35 }
  0xcc   :  { %2760 = vmatpush3.bf16.msra.mxu0 %v3024_v4  ;;  %v3060_v4 = vld [vmem:[#allocation7 + $0x8] sm:$0xff]  }
  0xcd   :  { %2782 = vmatpush3.bf16.msra.mxu1 %v3025_v5  ;;  %2761 = vmatprep.subr.bf16.mxu0 %v3026_v6  ;;  %v3061_v5 = vld [vmem:[#allocation7] sm:$0xff]  }
  0xce   :  { %2783 = vmatprep.subr.bf16.mxu1 %v3027_v7 }
  0xd0   :  { %2762 = vmatpush3.bf16.msra.mxu0 %v3028_v8 }
  0xd1   :  { %2784 = vmatpush3.bf16.msra.mxu1 %v3029_v9  ;;  %2763 = vmatprep.subr.bf16.mxu0 %v3030_v10 }
  0xd2   :  { %2785 = vmatprep.subr.bf16.mxu1 %v3031_v11 }
  0xd4   :  { %2764 = vmatpush3.bf16.msra.mxu0 %v3032_v12 }
  0xd5   :  { %2786 = vmatpush3.bf16.msra.mxu1 %v3033_v13  ;;  %2765 = vmatprep.subr.bf16.mxu0 %v3034_v14 }
  0xd6   :  { %2787 = vmatprep.subr.bf16.mxu1 %v3035_v15 }
  0xd8   :  { %2766 = vmatpush3.bf16.msra.mxu0 %v3036_v16 }
  0xd9   :  { %2788 = vmatpush3.bf16.msra.mxu1 %v3037_v17  ;;  %2767 = vmatprep.subr.bf16.mxu0 %v3038_v18 }
  0xda   :  { %2789 = vmatprep.subr.bf16.mxu1 %v3039_v19 }
  0xdc   :  { %2768 = vmatpush3.bf16.msra.mxu0 %v3040_v20 }
  0xdd   :  { %2790 = vmatpush3.bf16.msra.mxu1 %v3041_v21  ;;  %2769 = vmatprep.subr.bf16.mxu0 %v3042_v22 }
  0xde   :  { %2791 = vmatprep.subr.bf16.mxu1 %v3043_v23 }
  0xe0   :  { %2770 = vmatpush3.bf16.msra.mxu0 %v3044_v24 }
  0xe1   :  { %2792 = vmatpush3.bf16.msra.mxu1 %v3045_v25  ;;  %2771 = vmatprep.subr.bf16.mxu0 %v3046_v26 }
  0xe2   :  { %2793 = vmatprep.subr.bf16.mxu1 %v3047_v27 }
  0xe4   :  { %2772 = vmatpush3.bf16.msra.mxu0 %v3048_v28 }
  0xe5   :  { %2794 = vmatpush3.bf16.msra.mxu1 %v3049_v29  ;;  %2810 = vmatprep.subr.bf16.mxu0 %v3153_v50 }
  0xe7   :  { %2133 = vmatmul.mubr.bf16.vlgmr.msra.gmra.mxu0 %v2332_v32 }
  0xe8   :  { %2173 = vmatmul.mubr.bf16.vlgmr.msra.gmra.mxu1 %v2334_v34  ;;  %2811 = vmatpush3.bf16.msra.mxu0 %v3054_v49 }
  0xe9   :  { %2812 = vmatprep.subr.bf16.mxu0 %v3153_v50  ;;  %2826 = vmatprep.mubr.msk.bf16.mxu0 %vm3154_vm0, %v3153_v50 }
  0xec   :  { %2813 = vmatpush3.bf16.msra.mxu0 %v3055_v51 }
  0xed   :  { %2814 = vmatprep.subr.bf16.mxu0 %v3153_v50 }
  0xf0   :  { %2815 = vmatpush3.bf16.msra.mxu0 %v3056_v52 }
  0xf1   :  { %2816 = vmatprep.subr.bf16.mxu0 %v3153_v50 }
  0xf4   :  { %2817 = vmatpush3.bf16.msra.mxu0 %v3057_v53 }
  0xf5   :  { %2818 = vmatprep.subr.bf16.mxu0 %v3153_v50 }
  0xf8   :  { %2819 = vmatpush3.bf16.msra.mxu0 %v3058_v54 }
  0xf9   :  { %2820 = vmatprep.subr.bf16.mxu0 %v3153_v50 }
  0xfc   :  { %2821 = vmatpush3.bf16.msra.mxu0 %v3059_v61 }
  0xfd   :  { %2822 = vmatprep.subr.bf16.mxu0 %v3153_v50 }
 0x100   :  { %2823 = vmatpush3.bf16.msra.mxu0 %v3060_v4 }
 0x101   :  { %2824 = vmatprep.subr.bf16.mxu0 %v3153_v50 }
 0x104   :  { %2825 = vmatpush3.bf16.msra.mxu0 %v3061_v5 }
 0x107   :  { %v2553_v36 = vpop.f32.mrf.mxu0 }
 0x108   :  { %v2575_v37 = vpop.f32.mrf.mxu1 }
 0x109   :  { %v2554_v39 = vpop.f32.mrf.mxu0 }
 0x10a   :  { %v2576_v40 = vpop.f32.mrf.mxu1  ;;  %v2555_v41 = vadd.f32 %v2554_v39, %v2553_v36 }
 0x10b   :  { %v2577_v42 = vadd.f32 %v2576_v40, %v2575_v37  ;;  %v2556_v43 = vpop.f32.mrf.mxu0 }
 0x10c   :  { %v2578_v44 = vpop.f32.mrf.mxu1  ;;  %v1735_v45 = vadd.f32 %v2555_v41, %v2311_v38 }
 0x10d   :  { %v2557_v46 = vpop.f32.mrf.mxu0 }
 0x10e   :  { %v2579_v47 = vpop.f32.mrf.mxu1  ;;  %v1775_v48 = vadd.f32 %v2577_v42, %v1735_v45 }
 0x127   :  { %v2597_v55 = vpop.f32.mrf.mxu0 }
 0x128   :  { %v2619_v56 = vpop.f32.mrf.mxu1 }
 0x129   :  { %v2598_v57 = vpop.f32.mrf.mxu0 }
 0x12a   :  { %v2620_v58 = vpop.f32.mrf.mxu1  ;;  %v2599_v59 = vadd.f32 %v2598_v57, %v2597_v55 }
 0x12b   :  { %v2621_v60 = vadd.f32 %v2620_v58, %v2619_v56  ;;  %v2600_v62 = vpop.f32.mrf.mxu0  ;;  %v2528_v56 = vld [vmem:[%s3208_s4] ss:$0 sm:$0xff] }
 0x12c   :  { %v2622_v63 = vpop.f32.mrf.mxu1  ;;  %v1815_v0 = vadd.f32 %v2599_v59, %v1775_v48 }
 0x12d   :  { %v2601_v1 = vpop.f32.mrf.mxu0 }
 0x12e   :  { %v2623_v2 = vpop.f32.mrf.mxu1  ;;  %v1855_v3 = vadd.f32 %v2621_v60, %v1815_v0 }
 0x147   :  { %v2641_v6 = vpop.f32.mrf.mxu0 }
 0x148   :  { %v2663_v7 = vpop.f32.mrf.mxu1 }
 0x149   :  { %v2642_v8 = vpop.f32.mrf.mxu0 }
 0x14a   :  { %v2643_v9 = vadd.f32 %v2642_v8, %v2641_v6  ;;  %v2664_v10 = vpop.f32.mrf.mxu1 }
 0x14b   :  { %v2665_v11 = vadd.f32 %v2664_v10, %v2663_v7  ;;  %v2644_v12 = vpop.f32.mrf.mxu0 }
 0x14c   :  { %v1895_v13 = vadd.f32 %v2643_v9, %v1855_v3  ;;  %v2666_v14 = vpop.f32.mrf.mxu1 }
 0x14d   :  { %v2645_v15 = vpop.f32.mrf.mxu0 }
 0x14e   :  { %v1935_v16 = vadd.f32 %v2665_v11, %v1895_v13  ;;  %v2667_v17 = vpop.f32.mrf.mxu1 }
 0x167   :  { %v2685_v18 = vpop.f32.mrf.mxu0 }
 0x168   :  { %v2707_v19 = vpop.f32.mrf.mxu1 }
 0x169   :  { %v2686_v20 = vpop.f32.mrf.mxu0 }
 0x16a   :  { %v2708_v21 = vpop.f32.mrf.mxu1  ;;  %v2687_v34 = vadd.f32 %v2686_v20, %v2685_v18 }
 0x16b   :  { %v2688_v22 = vpop.f32.mrf.mxu0  ;;  %v2709_v36 = vadd.f32 %v2708_v21, %v2707_v19 }
 0x16c   :  { %v2710_v23 = vpop.f32.mrf.mxu1  ;;  %v1975_v35 = vadd.f32 %v2687_v34, %v1935_v16 }
 0x16d   :  { %v2689_v24 = vpop.f32.mrf.mxu0 }
 0x16e   :  { %v2711_v25 = vpop.f32.mrf.mxu1  ;;  %v2015_v38 = vadd.f32 %v2709_v36, %v1975_v35 }
 0x187   :  { %v2729_v26 = vpop.f32.mrf.mxu0 }
 0x188   :  { %v2751_v27 = vpop.f32.mrf.mxu1 }
 0x189   :  { %v2730_v28 = vpop.f32.mrf.mxu0 }
 0x18a   :  { %v2752_v29 = vpop.f32.mrf.mxu1  ;;  %v2731_v37 = vadd.f32 %v2730_v28, %v2729_v26 }
 0x18b   :  { %v2732_v30 = vpop.f32.mrf.mxu0  ;;  %v2753_v40 = vadd.f32 %v2752_v29, %v2751_v27 }
 0x18c   :  { %v2754_v31 = vpop.f32.mrf.mxu1  ;;  %v2055_v39 = vadd.f32 %v2731_v37, %v2015_v38 }
 0x18d   :  { %v2733_v32 = vpop.f32.mrf.mxu0 }
 0x18e   :  { %v2755_v33 = vpop.f32.mrf.mxu1  ;;  %v2095_v44 = vadd.f32 %v2753_v40, %v2055_v39 }
 0x1a7   :  { %v2773_v41 = vpop.f32.mrf.mxu0 }
 0x1a8   :  { %v2795_v42 = vpop.f32.mrf.mxu1 }
 0x1a9   :  { %v2774_v43 = vpop.f32.mrf.mxu0 }
 0x1aa   :  { %v2775_v45 = vadd.f32 %v2774_v43, %v2773_v41  ;;  %v2796_v46 = vpop.f32.mrf.mxu1 }
 0x1ab   :  { %v2776_v47 = vpop.f32.mrf.mxu0  ;;  %v2797_v49 = vadd.f32 %v2796_v46, %v2795_v42 }
 0x1ac   :  { %v2135_v48 = vadd.f32 %v2775_v45, %v2095_v44  ;;  %v2798_v50 = vpop.f32.mrf.mxu1 }
 0x1ad   :  { %v2777_v51 = vpop.f32.mrf.mxu0 }
 0x1ae   :  { %v2175_v52 = vadd.f32 %v2797_v49, %v2135_v48  ;;  %v2799_v53 = vpop.f32.mrf.mxu1 }
 0x1b0   :  { %v2180_v54 = vmax.f32 %v2175_v52, 0.0 }
 0x1b2   :  { %v2181_v55 = vpack.c.bf16 %v2180_v54, %v2180_v54 }
 0x1b4   :  { %2827 = vmatmul.mubr.bf16.vlgmr.msra.gmra.mxu0 %v2181_v55 }
 0x274   :  { %v2287_v57 = vpop.f32.mrf.mxu0 }
 0x275   :  { %v2288_v58 = vadd.f32 %v2528_v56, %v2287_v57 }
 0x276   :  { %v2828_v59 = vpop.f32.mrf.mxu0 }
 0x277   :  { %v2293_v60 = vpack.c.bf16 %v2288_v58, %v2288_v58 }
 0x278   :  { %v2290_v61 = vpop.f32.mrf.mxu0 }
 0x279   :  { %2294 = vst [vmem:[#allocation8] sm:$0xf] %v2293_v60 }
 0x27a   :  { %v2829_v62 = vpop.f32.mrf.mxu0 }
 0x27b   :  { %3133 = shalt.err (!%p3130_p5)
}
 0x27c   :  { %2304 = dma.vmem_to_hbm [thread:$0]  %s2302_s11, 64, %s3209_s5, [#allocation4]  }
 0x27d   :  { %3146 = dma.done.wait [#allocation4], 64  }
 0x27e   :  { %3147 = vsyncadd [#allocation4], 4294967232 }
 0x27f   :  { %2308 = vsyncpa [#allocation3], 1 }
 0x280   :  { %2309 = vsyncpa [#allocation6], 1 }
 0x281   :  { %2310 = vsyncpa [#allocation4], 1 }

</bundles_post_ra>
